<compile_context>
chip_gen: v7x
topology: tpu7x:2x2x1
jax: 0.10.0
libtpu: 0.0.40
codegen_flags: <defaults>
</compile_context>

<pallas_src>
import jax
import jax.numpy as jnp
from jax import lax
from jax.experimental import pallas as pl
from jax.experimental.pallas import tpu as pltpu

_INV_SQRT2 = 0.7071067811865476      # 1 / sqrt(2)
_INV_SQRT_2PI = 0.3989422804014327   # 1 / sqrt(2*pi)


def _gelu_backward_kernel(grad_ref, x_ref, out_ref):
    grad = grad_ref[...]
    x = x_ref[...]
    t = x * jnp.float32(_INV_SQRT2)                          # reused for erf and exp
    cdf = jnp.float32(0.5) * lax.erf(t) + jnp.float32(0.5)   # Phi(x)  (VPU polynomial)
    pdf = jnp.exp(-(t * t)) * jnp.float32(_INV_SQRT_2PI)     # phi(x)  (exp -> EUP slot)
    out_ref[...] = (grad * (cdf + x * pdf)).astype(out_ref.dtype)


def gelu_backward_ref(grad, x):
    t = x * _INV_SQRT2
    cdf = 0.5 * (1.0 + lax.erf(t))
    pdf = jnp.exp(-(t * t)) * _INV_SQRT_2PI
    return grad * (cdf + x * pdf)


def _device_config():
    """(tile_r, tile_c, vmem_limit_bytes, is_v7x)."""
    try:
        kind = jax.devices()[0].device_kind.lower()
    except Exception:
        kind = ""
    is_v7 = ("v7" in kind) or ("7x" in kind)
    if is_v7:
        # v7x: 64 MiB VMEM/TC. (512,2048) f32 = 4 MiB/block; 3 streams x 2
        # double-buffers = 24 MiB -> comfortably under a 48 MiB scoped limit.
        return 512, 2048, 48 << 20, True
    # v5e/v6e: 128 MiB VMEM. Raise v5e's 16 MiB scoped default so the
    # (512,2048) blocks can double-buffer.
    return 512, 2048, 64 << 20, False


_LANE_WIDTHS = (2048, 1024, 512, 256, 128)


def _widest_lane_width(total):
    """Largest L (multiple of 128, <= 2048) dividing `total`, else None."""
    for L in _LANE_WIDTHS:
        if total % L == 0:
            return L
    return None


def _is_tracer(v):
    try:
        return isinstance(v, jax.core.Tracer)
    except Exception:
        return False


def gelu_backward(grad, x, *, block_r=None, block_c=None,
                  xla_fallback_below=1 << 20, alias_grad=None):
    assert grad.shape == x.shape and grad.dtype == x.dtype
    assert grad.ndim == 2
    R, C = grad.shape
    total = R * C

    # Small/medium inputs: Pallas launch + pipeline ramp dominates; XLA's fused
    # elementwise is already at roofline. Threshold ~ one full (512,2048) tile.
    if total < xla_fallback_below:
        return gelu_backward_ref(grad, x)

    tile_r, tile_c, vmem_limit, is_v7 = _device_config()
    if block_r is not None:
        tile_r = block_r
    if block_c is not None:
        tile_c = block_c

    # --- present a lane-dense 2-D slab (zero-copy row-major reshape) --------
    g2, x2 = grad, x
    padded_c = C
    L = _widest_lane_width(total)
    if L is None:
        # Awkward lane width: pad last dim up to a multiple of 128 so stores
        # are full-lane vst rather than masked vst.msk (pad -> run -> slice).
        padded_c = ((C + 127) // 128) * 128
        g2 = jnp.pad(grad, ((0, 0), (0, padded_c - C)))
        x2 = jnp.pad(x, ((0, 0), (0, padded_c - C)))
        L = _widest_lane_width(R * padded_c)
    rows = (R * padded_c) // L
    reshaped = (rows, L) != (R, padded_c)
    if reshaped:
        g2 = g2.reshape(rows, L)
        x2 = x2.reshape(rows, L)
    R2, C2 = rows, L

    # Block dims: either the full array extent or a multiple of (8, 128).
    br = R2 if R2 <= tile_r else tile_r
    bc = C2 if C2 <= tile_c else tile_c

    # Only v7x (2 TensorCores/chip) benefits from forcing >= 2 programs; on the
    # single-TC v5e/v6e the grid is a sequential loop and splitting a 1x1 grid
    # just adds a grid step and halves the block.
    if is_v7 and pl.cdiv(R2, br) * pl.cdiv(C2, bc) == 1 and R2 >= 16:
        br = ((pl.cdiv(R2, 2) + 7) // 8) * 8

    grid = (pl.cdiv(R2, br), pl.cdiv(C2, bc))

    # v7x: request CORE_PARALLEL on the row-block axis so both TCs are used;
    # keep a plain-"parallel" fallback in case lowering rejects it.
    core_parallel = getattr(pltpu, "CORE_PARALLEL", None)
    if is_v7 and grid[0] >= 2 and core_parallel is not None:
        semantics_candidates = [(core_parallel, pltpu.PARALLEL),
                                ("parallel", "parallel")]
    else:
        semantics_candidates = [("parallel", "parallel")]

    # Advisory cost hint for XLA scheduling around this memory-bound call.
    n_elems = R2 * C2
    itemsize = grad.dtype.itemsize
    cost = pl.CostEstimate(flops=20 * n_elems,
                           transcendentals=n_elems,
                           bytes_accessed=3 * n_elems * itemsize)

    # Alias grad -> output only when it can actually be copy-free (under jit
    # with grad dead after this op). In eager mode aliasing a non-donated
    # parameter forces an extra HBM copy, so default it off there.
    if alias_grad is None:
        alias_grad = _is_tracer(grad)
    io_aliases = {0: 0} if alias_grad else {}

    out2 = None
    last_err = None
    for sems in semantics_candidates:
        try:
            out2 = pl.pallas_call(
                _gelu_backward_kernel,
                out_shape=jax.ShapeDtypeStruct((R2, C2), grad.dtype),
                grid=grid,
                in_specs=[
                    pl.BlockSpec((br, bc), lambda i, j: (i, j)),
                    pl.BlockSpec((br, bc), lambda i, j: (i, j)),
                ],
                out_specs=pl.BlockSpec((br, bc), lambda i, j: (i, j)),
                input_output_aliases=io_aliases,
                cost_estimate=cost,
                compiler_params=pltpu.CompilerParams(
                    dimension_semantics=sems,
                    vmem_limit_bytes=vmem_limit,
                ),
            )(g2, x2)
            break
        except Exception as e:  # pragma: no cover - CORE_PARALLEL fallback
            last_err = e
    if out2 is None:
        raise last_err

    out = out2.reshape(R, padded_c) if reshaped else out2
    if padded_c != C:
        out = out[:, :C]
    return out


if __name__ == "__main__":
    # Shapes consistent with the module's ([-1, -1], float32) inputs.
    # 1) Simple aligned shape: forces the Pallas path.
    kg, kx = jax.random.split(jax.random.PRNGKey(0))
    R, C = 16, 256
    grad = jax.random.normal(kg, (R, C), dtype=jnp.float32)
    x = jax.random.normal(kx, (R, C), dtype=jnp.float32)
    ref = gelu_backward_ref(grad, x)
    out = jax.block_until_ready(gelu_backward(grad, x, xla_fallback_below=0))
    assert out.shape == (R, C) and out.dtype == jnp.float32
    assert jnp.allclose(out, ref, atol=1e-5, rtol=1e-5)

    # 2) Non-128-multiple C but 128-divisible total: exercises the widest
    #    lane-dense flatten.
    kg2, kx2 = jax.random.split(jax.random.PRNGKey(1))
    R2, C2 = 192, 320
    grad2 = jax.random.normal(kg2, (R2, C2), dtype=jnp.float32)
    x2 = jax.random.normal(kx2, (R2, C2), dtype=jnp.float32)
    ref2 = gelu_backward_ref(grad2, x2)
    out2 = jax.block_until_ready(gelu_backward(grad2, x2, xla_fallback_below=0))
    assert out2.shape == (R2, C2)
    assert jnp.allclose(out2, ref2, atol=1e-5, rtol=1e-5)

    # 3) Awkward shape: exercises the pad-to-128 -> kernel -> slice path.
    kg3, kx3 = jax.random.split(jax.random.PRNGKey(2))
    R3, C3 = 10, 37
    grad3 = jax.random.normal(kg3, (R3, C3), dtype=jnp.float32)
    x3 = jax.random.normal(kx3, (R3, C3), dtype=jnp.float32)
    ref3 = gelu_backward_ref(grad3, x3)
    out3 = jax.block_until_ready(gelu_backward(grad3, x3, xla_fallback_below=0))
    assert out3.shape == (R3, C3)
    assert jnp.allclose(out3, ref3, atol=1e-5, rtol=1e-5)

    print("KERNEL_OK")
</pallas_src>

<mosaic_0001>
module attributes {stable_mosaic.version = 11 : i64} {
  func.func @_gelu_backward_kernel(%arg0: i32, %arg1: i32, %arg2: memref<2x2048xf32, #tpu.memory_space<vmem>>, %arg3: memref<2x2048xf32, #tpu.memory_space<vmem>>, %arg4: memref<2x2048xf32, #tpu.memory_space<vmem>>) attributes {dimension_semantics = [#tpu.dimension_semantics<parallel>, #tpu.dimension_semantics<parallel>], iteration_bounds = array<i64: 1, 1>, scalar_prefetch = 0 : i64, scratch_operands = 0 : i64, tpu.core_type = #tpu.core_type<tc>, window_params = [{transform_indices = @transform_0, window_bounds = array<i64: 2, 2048>}, {transform_indices = @transform_1, window_bounds = array<i64: 2, 2048>}, {transform_indices = @transform_2, window_bounds = array<i64: 2, 2048>}]} {
    %c0 = arith.constant 0 : index
    %c0_0 = arith.constant 0 : index
    %0 = vector.load %arg2[%c0, %c0_0] : memref<2x2048xf32, #tpu.memory_space<vmem>>, vector<2x2048xf32>
    %c0_1 = arith.constant 0 : index
    %c0_2 = arith.constant 0 : index
    %1 = vector.load %arg3[%c0_1, %c0_2] : memref<2x2048xf32, #tpu.memory_space<vmem>>, vector<2x2048xf32>
    %cst = arith.constant 0.707106769 : f32
    %2 = vector.broadcast %cst : f32 to vector<2x2048xf32>
    %3 = arith.mulf %1, %2 : vector<2x2048xf32>
    %4 = math.erf %3 : vector<2x2048xf32>
    %cst_3 = arith.constant 5.000000e-01 : f32
    %5 = vector.broadcast %cst_3 : f32 to vector<2x2048xf32>
    %6 = arith.mulf %5, %4 : vector<2x2048xf32>
    %cst_4 = arith.constant 5.000000e-01 : f32
    %7 = vector.broadcast %cst_4 : f32 to vector<2x2048xf32>
    %8 = arith.addf %6, %7 : vector<2x2048xf32>
    %9 = arith.mulf %3, %3 : vector<2x2048xf32>
    %cst_5 = arith.constant 0.000000e+00 : f32
    %10 = vector.broadcast %cst_5 : f32 to vector<2x2048xf32>
    %11 = arith.subf %10, %9 : vector<2x2048xf32>
    %12 = math.exp %11 : vector<2x2048xf32>
    %cst_6 = arith.constant 0.398942292 : f32
    %13 = vector.broadcast %cst_6 : f32 to vector<2x2048xf32>
    %14 = arith.mulf %12, %13 : vector<2x2048xf32>
    %15 = arith.mulf %1, %14 : vector<2x2048xf32>
    %16 = arith.addf %8, %15 : vector<2x2048xf32>
    %17 = arith.mulf %0, %16 : vector<2x2048xf32>
    %c0_7 = arith.constant 0 : index
    %c0_8 = arith.constant 0 : index
    %18 = vector.load %arg4[%c0_7, %c0_8] : memref<2x2048xf32, #tpu.memory_space<vmem>>, vector<2x2048xf32>
    tpu.vector_store %arg4[%c0_7, %c0_8], %17 {strides = array<i32>} : memref<2x2048xf32, #tpu.memory_space<vmem>>, vector<2x2048xf32>,
    return
  }
  func.func @transform_0(%arg0: i32, %arg1: i32) -> (i32, i32) {
    %c0_i32 = arith.constant 0 : i32
    return %arg0, %arg1 : i32, i32
  }
  func.func @transform_1(%arg0: i32, %arg1: i32) -> (i32, i32) {
    %c0_i32 = arith.constant 0 : i32
    return %arg0, %arg1 : i32, i32
  }
  func.func @transform_2(%arg0: i32, %arg1: i32) -> (i32, i32) {
    %c0_i32 = arith.constant 0 : i32
    return %arg0, %arg1 : i32, i32
  }
}

</mosaic_0001>

<bundles_post_ra>
// kernel: tpu_custom_call.1
= control target key start
LH: loop header
LB: loop body
LE: loop exit
PB: predicated region body
PF: predicated region fallthrough
CT: control target
= control target key end

     0   :  { %7 = vsyncpa [#allocation3], 0  ;;  %s257_s0 = inlined_call_operand.hbm [shape: f32[2,2048], index: 0, kind: input, shape index: {}]   ;;  %s258_s1 = inlined_call_operand.hbm [shape: f32[2,2048], index: 1, kind: input, shape index: {}]   ;;  %s259_s2 = inlined_call_operand.hbm [shape: f32[2,2048], index: 2, kind: output, shape index: {}]  }
   0x1   :  { %8 = vsyncpa [#allocation6], 0 }
   0x2   :  { %9 = vsyncpa [#allocation4], 0  ;;  %s203_s9 = smov [#allocation2]   ;;  %s204_s11 = smov [#allocation5]  }
   0x3   :  { %s16_s10 = sshll.u32 %s203_s9, 4  ;;  %s26_s12 = sshll.u32 %s204_s11, 4  ;;  %s17_s10 = int_to_ptr.vmem [resolvable:$true] %s16_s10  ;;  %s27_s12 = int_to_ptr.vmem [resolvable:$true] %s26_s12 }
   0x4   :  { %s131_s15 = scalar_lea.hbm %s257_s0, 512 }
   0x5   :  { %p132_p0 = scmp.ne.s32.totalorder %s257_s0, %s131_s15  ;;  %p135_p1 = scmp.lt.u32.totalorder %s131_s15, %s257_s0 }
   0x7   :  { %p137_p2 = pnand %p135_p1, %p132_p0 }
   0x9   :  { %140 = shalt.err (!%p137_p2)
}
   0xa   :  { %s141_s20 = scalar_lea.vmem %s17_s10, 512  ;;  %p146_p4 = scmp.lt.s32.totalorder %s17_s10, %s17_s10 }
   0xb   :  { %p142_p3 = scmp.ne.s32.totalorder %s17_s10, %s141_s20  ;;  %p147_p5 = scmp.lt.s32.totalorder %s141_s20, %s141_s20 }
   0xd   :  { %p148_p6 = por %p147_p5, %p146_p4 }
   0xf   :  { %p149_p7 = pnand %p148_p6, %p142_p3 }
  0x11   :  { %152 = shalt.err (!%p149_p7)
}
  0x12   :  { %19 = dma.hbm_to_vmem [thread:$0]  %s257_s0, 512, %s17_s10, [#allocation3]  }
  0x13   :  { %s153_s25 = scalar_lea.hbm %s258_s1, 512 }
  0x14   :  { %p154_p8 = scmp.ne.s32.totalorder %s258_s1, %s153_s25  ;;  %p157_p9 = scmp.lt.u32.totalorder %s153_s25, %s258_s1 }
  0x16   :  { %p159_p10 = pnand %p157_p9, %p154_p8 }
  0x18   :  { %162 = shalt.err (!%p159_p10)
}
  0x19   :  { %s163_s30 = scalar_lea.vmem %s27_s12, 512  ;;  %p168_p12 = scmp.lt.s32.totalorder %s27_s12, %s27_s12 }
  0x1a   :  { %p164_p11 = scmp.ne.s32.totalorder %s27_s12, %s163_s30  ;;  %p169_p13 = scmp.lt.s32.totalorder %s163_s30, %s163_s30 }
  0x1c   :  { %p170_p0 = por %p169_p13, %p168_p12 }
  0x1e   :  { %p171_p1 = pnand %p170_p0, %p164_p11 }
  0x20   :  { %174 = shalt.err (!%p171_p1)
}
  0x21   :  { %29 = dma.hbm_to_vmem [thread:$0]  %s258_s1, 512, %s27_s12, [#allocation6]  }
  0x22   :  { %197 = dma.done.wait [#allocation3], 512  }
  0x23   :  { %198 = vsyncadd [#allocation3], 4294966784 }
  0x24   :  { %199 = dma.done.wait [#allocation6], 512  }
  0x25   :  { %200 = vsyncadd [#allocation6], 4294966784  ;;  %v40_v0 = vld [vmem:[#allocation5] sm:$0xff]  ;;  %v41_v2 = vld [vmem:[#allocation5 + $0x8] sm:$0xff]  ;;  %s205_s1 = smov [#allocation7]  }
  0x26   :  { %v44_v1 = vmul.f32 0.70710677, %v40_v0  ;;  %v42_v3 = vld [vmem:[#allocation5 + $0x10] sm:$0xff]  ;;  %v45_v4 = vmul.f32 0.70710677, %v41_v2  ;;  %v43_v6 = vld [vmem:[#allocation5 + $0x18] sm:$0xff] }
  0x27   :  { %v46_v5 = vmul.f32 0.70710677, %v42_v3  ;;  %v47_v8 = vmul.f32 0.70710677, %v43_v6  ;;  %v36_v39 = vld [vmem:[#allocation2] sm:$0xff]  ;;  %v37_v44 = vld [vmem:[#allocation2 + $0x8] sm:$0xff] }
  0x28   :  { %115 = verf.f32 %v44_v1  ;;  %v60_v7 = vmul.f32 %v44_v1, %v44_v1  ;;  %v61_v9 = vmul.f32 %v45_v4, %v45_v4  ;;  %v38_v47 = vld [vmem:[#allocation2 + $0x10] sm:$0xff]  ;;  %v39_v51 = vld [vmem:[#allocation2 + $0x18] sm:$0xff]  ;;  %s102_s4 = sshll.u32 %s205_s1, 4  ;;  %s103_s4 = int_to_ptr.vmem [resolvable:$true] %s102_s4 }
  0x29   :  { %117 = verf.f32 %v45_v4  ;;  %v62_v10 = vmul.f32 %v46_v5, %v46_v5  ;;  %v63_v12 = vmul.f32 %v47_v8, %v47_v8  ;;  %s175_s5 = scalar_lea.vmem %s103_s4, 512  ;;  %p180_p3 = scmp.lt.s32.totalorder %s103_s4, %s103_s4 }
  0x2a   :  { %v64_v11 = vsub.f32 0.0, %v60_v7  ;;  %119 = verf.f32 %v46_v5  ;;  %v65_v13 = vsub.f32 0.0, %v61_v9  ;;  %p176_p2 = scmp.ne.s32.totalorder %s103_s4, %s175_s5  ;;  %p181_p4 = scmp.lt.s32.totalorder %s175_s5, %s175_s5 }
  0x2b   :  { %v66_v14 = vsub.f32 0.0, %v62_v10  ;;  %121 = verf.f32 %v47_v8  ;;  %v67_v16 = vsub.f32 0.0, %v63_v12 }
  0x2c   :  { %v68_v15 = vmul.f32 1.442695, %v64_v11  ;;  %v70_v17 = vmul.f32 1.442695, %v65_v13  ;;  %p182_p5 = por %p181_p4, %p180_p3 }
  0x2d   :  { %v72_v18 = vmul.f32 1.442695, %v66_v14  ;;  %v74_v19 = vmul.f32 1.442695, %v67_v16 }
  0x2e   :  { %123 = vpow2.f32 %v68_v15  ;;  %p183_p6 = pnand %p182_p5, %p176_p2 }
  0x2f   :  { %125 = vpow2.f32 %v70_v17 }
  0x30   :  { %127 = vpow2.f32 %v72_v18 }
  0x31   :  { %129 = vpow2.f32 %v74_v19 }
  0x32   :  { %v116_v20 = vpop.eup %115 }
  0x33   :  { %v118_v21 = vpop.eup %117  ;;  %v52_v24 = vmul.f32 0.5, %v116_v20 }
  0x34   :  { %v120_v22 = vpop.eup %119  ;;  %v53_v25 = vmul.f32 0.5, %v118_v21 }
  0x35   :  { %v122_v23 = vpop.eup %121  ;;  %v54_v26 = vmul.f32 0.5, %v120_v22  ;;  %v56_v30 = vadd.f32 0.5, %v52_v24 }
  0x36   :  { %v55_v28 = vmul.f32 0.5, %v122_v23  ;;  %v57_v33 = vadd.f32 0.5, %v53_v25 }
  0x37   :  { %v58_v37 = vadd.f32 0.5, %v54_v26 }
  0x38   :  { %v124_v27 = vpop.eup %123  ;;  %v59_v41 = vadd.f32 0.5, %v55_v28 }
  0x39   :  { %v126_v29 = vpop.eup %125  ;;  %v76_v31 = vmul.f32 0.3989423, %v124_v27 }
  0x3a   :  { %v128_v32 = vpop.eup %127  ;;  %v77_v34 = vmul.f32 0.3989423, %v126_v29 }
  0x3b   :  { %v130_v35 = vpop.eup %129  ;;  %v80_v36 = vmul.f32 %v76_v31, %v40_v0  ;;  %v78_v38 = vmul.f32 0.3989423, %v128_v32 }
  0x3c   :  { %v81_v40 = vmul.f32 %v77_v34, %v41_v2  ;;  %v79_v42 = vmul.f32 0.3989423, %v130_v35 }
  0x3d   :  { %v84_v43 = vadd.f32 %v80_v36, %v56_v30  ;;  %v82_v45 = vmul.f32 %v78_v38, %v42_v3 }
  0x3e   :  { %v85_v46 = vadd.f32 %v81_v40, %v57_v33  ;;  %v83_v48 = vmul.f32 %v79_v42, %v43_v6 }
  0x3f   :  { %v88_v49 = vmul.f32 %v84_v43, %v36_v39  ;;  %v86_v50 = vadd.f32 %v82_v45, %v58_v37 }
  0x40   :  { %v89_v52 = vmul.f32 %v85_v46, %v37_v44  ;;  %v87_v53 = vadd.f32 %v83_v48, %v59_v41 }
  0x41   :  { %92 = vst [vmem:[#allocation7] sm:$0xff] %v88_v49  ;;  %v90_v54 = vmul.f32 %v86_v50, %v38_v47 }
  0x42   :  { %93 = vst [vmem:[#allocation7 + $0x8] sm:$0xff] %v89_v52  ;;  %v91_v55 = vmul.f32 %v87_v53, %v39_v51 }
  0x43   :  { %94 = vst [vmem:[#allocation7 + $0x10] sm:$0xff] %v90_v54 }
  0x44   :  { %95 = vst [vmem:[#allocation7 + $0x18] sm:$0xff] %v91_v55 }
  0x45   :  { %186 = shalt.err (!%p183_p6)
}
  0x46   :  { %s187_s8 = scalar_lea.hbm %s259_s2, 512 }
  0x47   :  { %p188_p7 = scmp.ne.s32.totalorder %s259_s2, %s187_s8  ;;  %p191_p8 = scmp.lt.u32.totalorder %s187_s8, %s259_s2 }
  0x49   :  { %p193_p9 = pnand %p191_p8, %p188_p7 }
  0x4b   :  { %196 = shalt.err (!%p193_p9)
}
  0x4c   :  { %105 = dma.vmem_to_hbm [thread:$0]  %s103_s4, 512, %s259_s2, [#allocation4]  }
  0x4d   :  { %201 = dma.done.wait [#allocation4], 512  }
  0x4e   :  { %202 = vsyncadd [#allocation4], 4294966784 }
  0x4f   :  { %109 = vsyncpa [#allocation3], 1 }
  0x50   :  { %110 = vsyncpa [#allocation6], 1 }
  0x51   :  { %111 = vsyncpa [#allocation4], 1 }

</bundles_post_ra>
